<compile_context>
chip_gen: v7x
topology: tpu7x:2x2x1
jax: 0.10.0
libtpu: 0.0.40
codegen_flags: <defaults>
</compile_context>

<pallas_src>
import functools

import jax
import jax.numpy as jnp
from jax.experimental import pallas as pl
from jax.experimental.pallas import tpu as pltpu

BN_EPS = 1e-5
LANE = 128
ALIGN = 16  # bf16 packs 2 rows per sublane; keep each weight block 16-row aligned


def _round_up(n, m):
    return (n + m - 1) // m * m


def _slab_layout(state_size, action_size):
    """Row layout of the compact bf16 parameter slab."""
    dims = ((state_size, 32), (32, 64), (64, 64), (64, 16), (16, action_size))
    offs = []
    cur = 0
    for fi, _ in dims:
        offs.append(cur)
        cur += _round_up(fi, ALIGN)
    bias_off = cur                       # 5 bias rows live at bias_off + layer
    slab_rows = _round_up(bias_off + 8, ALIGN)
    return dims, tuple(offs), bias_off, slab_rows


def dqn_kernel(x_ref, bn_ref, wb_ref, out_ref, *, dims, w_offs, bias_off, a_pad):
    # Folded BatchNorm (whole-batch stats computed in the wrapper): x * s + t.
    s = bn_ref[0:1, :]
    t = bn_ref[1:2, :]
    h = x_ref[...] * s + t                                   # [tile_b, S] f32

    def linear(h, idx):
        fi, fo = dims[idx]
        fo = a_pad if idx == len(dims) - 1 else fo           # last layer padded to 8
        off = w_offs[idx]
        w = wb_ref[off:off + fi, :fo]                        # [fi, fo] bf16
        b = wb_ref[bias_off + idx:bias_off + idx + 1, :fo].astype(jnp.float32)
        return jnp.dot(h.astype(jnp.bfloat16), w,
                       preferred_element_type=jnp.float32) + b

    h = jnp.tanh(linear(h, 0))            # fc0 + tanh   -> [tile_b, 32]
    h = jnp.tanh(linear(h, 1))            # fc1 + tanh   -> [tile_b, 64]
    h = jnp.tanh(linear(h, 2))            # fc2 + tanh   -> [tile_b, 64]
    h = jnp.maximum(linear(h, 3), 0.0)    # fc3 + relu   -> [tile_b, 16]
    out_ref[...] = linear(h, 4).astype(out_ref.dtype)        # fc4 -> [tile_b, a_pad]


def deep_q_network(x, gamma, beta, wb_slab, *, action_size, block_b=1024):
    """DQN forward. x: [B, state_size] f32. Returns [B, action_size] f32."""
    B, S = x.shape
    assert S <= LANE and action_size <= LANE

    # Training-mode BatchNorm1d statistics over the WHOLE batch (matches the
    # PyTorch default), folded to x*s + t so batch tiling is exact.
    mean = jnp.mean(x, axis=0)
    var = jnp.mean(jnp.square(x - mean), axis=0)              # biased variance
    s = gamma * jax.lax.rsqrt(var + BN_EPS)
    t = beta - mean * s
    bn = jnp.zeros((8, S), jnp.float32).at[0, :].set(s).at[1, :].set(t)

    # Tile selection: bounded last-tile padding, and >= 2 grid steps whenever
    # possible so ("parallel",) can shard the batch across v7x's two cores.
    n_tiles = max(2, -(-B // block_b))
    tile_b = _round_up(-(-B // n_tiles), 8)
    b_pad = _round_up(B, tile_b)
    grid = b_pad // tile_b
    x_pad = x if b_pad == B else jnp.zeros((b_pad, S), x.dtype).at[:B, :].set(x)

    a_pad = _round_up(action_size, 8)
    dims, w_offs, bias_off, slab_rows = _slab_layout(S, action_size)
    assert wb_slab.shape == (slab_rows, LANE) and wb_slab.dtype == jnp.bfloat16

    kernel = functools.partial(dqn_kernel, dims=dims, w_offs=w_offs,
                               bias_off=bias_off, a_pad=a_pad)
    # Per-step VMEM footprint is tiny (double-buffered (tile_b,S) in +
    # (tile_b,a_pad) out + ~53 KB slab), so default scoped-VMEM limits are fine
    # on all generations even for block_b in the thousands.
    out = pl.pallas_call(
        kernel,
        out_shape=jax.ShapeDtypeStruct((b_pad, a_pad), jnp.float32),
        grid=(grid,),
        in_specs=[
            pl.BlockSpec((tile_b, S), lambda i: (i, 0)),         # activations: tiled
            pl.BlockSpec((8, S), lambda i: (0, 0)),              # BN affine: resident
            pl.BlockSpec((slab_rows, LANE), lambda i: (0, 0)),   # param slab: resident
        ],
        out_specs=pl.BlockSpec((tile_b, a_pad), lambda i: (i, 0)),
        compiler_params=pltpu.CompilerParams(
            dimension_semantics=("parallel",)),                  # megacore on v7x
    )(x_pad, bn, wb_slab)
    return out[:B, :action_size]


def init_params(key, state_size, action_size):
    """PyTorch-equivalent init: Linear W,b ~ U(-1/sqrt(fan_in), 1/sqrt(fan_in)),
    BatchNorm1d gamma=1, beta=0. Weights stored pre-transposed as [in, out]."""
    dims = [(state_size, 32), (32, 64), (64, 64), (64, 16), (16, action_size)]
    params = {"gamma": jnp.ones((state_size,), jnp.float32),
              "beta": jnp.zeros((state_size,), jnp.float32)}
    for idx, (fi, fo) in enumerate(dims):
        key, kw, kb = jax.random.split(key, 3)
        bound = 1.0 / (fi ** 0.5)
        params[f"w{idx}"] = jax.random.uniform(
            kw, (fi, fo), jnp.float32, minval=-bound, maxval=bound)
        params[f"b{idx}"] = jax.random.uniform(
            kb, (fo,), jnp.float32, minval=-bound, maxval=bound)
    return params


def pack_param_slab(params, state_size, action_size):
    """Pack W0..W4 / b0..b4 into one compact bf16 [slab_rows, 128] slab (once)."""
    dims, offs, bias_off, slab_rows = _slab_layout(state_size, action_size)
    slab = jnp.zeros((slab_rows, LANE), jnp.float32)
    for idx, (fi, fo) in enumerate(dims):
        w = params[f"w{idx}"]
        b = params[f"b{idx}"]
        slab = slab.at[offs[idx]:offs[idx] + fi, :fo].set(w)
        slab = slab.at[bias_off + idx, :fo].set(b)
    return slab.astype(jnp.bfloat16)


def deep_q_network_ref(x, params):
    """Pure-JAX reference mirroring the PyTorch forward (training-mode BN)."""
    mean = jnp.mean(x, axis=0)
    var = jnp.mean(jnp.square(x - mean), axis=0)
    h = (x - mean) * jax.lax.rsqrt(var + BN_EPS) * params["gamma"] + params["beta"]
    hi = jax.lax.Precision.HIGHEST
    h = jnp.tanh(jnp.dot(h, params["w0"], precision=hi) + params["b0"])
    h = jnp.tanh(jnp.dot(h, params["w1"], precision=hi) + params["b1"])
    h = jnp.tanh(jnp.dot(h, params["w2"], precision=hi) + params["b2"])
    h = jnp.maximum(jnp.dot(h, params["w3"], precision=hi) + params["b3"], 0.0)
    return jnp.dot(h, params["w4"], precision=hi) + params["b4"]


if __name__ == "__main__":
    # NOTE: B=16 is a correctness demo; benchmark at replay-batch sizes (>=256).
    B, STATE_SIZE, ACTION_SIZE = 16, 8, 4
    key = jax.random.PRNGKey(0)
    k_x, k_p = jax.random.split(key)

    x = jax.random.normal(k_x, (B, STATE_SIZE), jnp.float32)
    params = init_params(k_p, STATE_SIZE, ACTION_SIZE)
    wb_slab = pack_param_slab(params, STATE_SIZE, ACTION_SIZE)

    fwd = jax.jit(functools.partial(deep_q_network, action_size=ACTION_SIZE))
    actions = fwd(x, params["gamma"], params["beta"], wb_slab)
    jax.block_until_ready(actions)

    assert actions.shape == (B, ACTION_SIZE)
    ref = deep_q_network_ref(x, params)
    max_diff = float(jnp.max(jnp.abs(actions - ref)))
    assert jnp.allclose(actions, ref, atol=2e-2, rtol=2e-2), (
        "max abs diff vs reference: %f" % max_diff)
    print("KERNEL_OK")
</pallas_src>

<mosaic_0001>
module attributes {stable_mosaic.version = 11 : i64} {
  func.func @dqn_kernel(%arg0: i32, %arg1: memref<8x8xf32, #tpu.memory_space<vmem>>, %arg2: memref<8x8xf32, #tpu.memory_space<vmem>>, %arg3: memref<208x128xbf16, #tpu.memory_space<vmem>>, %arg4: memref<8x8xf32, #tpu.memory_space<vmem>>) attributes {dimension_semantics = [#tpu.dimension_semantics<parallel>], iteration_bounds = array<i64: 2>, scalar_prefetch = 0 : i64, scratch_operands = 0 : i64, tpu.core_type = #tpu.core_type<tc>, window_params = [{transform_indices = @transform_0, window_bounds = array<i64: 8, 8>}, {pipeline_mode = #tpu.pipeline_mode<synchronous>, transform_indices = @transform_1, window_bounds = array<i64: 8, 8>}, {pipeline_mode = #tpu.pipeline_mode<synchronous>, transform_indices = @transform_2, window_bounds = array<i64: 208, 128>}, {transform_indices = @transform_3, window_bounds = array<i64: 8, 8>}]} {
    %c0 = arith.constant 0 : index
    %c0_0 = arith.constant 0 : index
    %0 = vector.load %arg2[%c0, %c0_0] : memref<8x8xf32, #tpu.memory_space<vmem>>, vector<1x8xf32>
    %c1 = arith.constant 1 : index
    %c0_1 = arith.constant 0 : index
    %1 = vector.load %arg2[%c1, %c0_1] : memref<8x8xf32, #tpu.memory_space<vmem>>, vector<1x8xf32>
    %c0_2 = arith.constant 0 : index
    %c0_3 = arith.constant 0 : index
    %2 = vector.load %arg1[%c0_2, %c0_3] : memref<8x8xf32, #tpu.memory_space<vmem>>, vector<8x8xf32>
    %3 = vector.broadcast %0 : vector<1x8xf32> to vector<8x8xf32>
    %4 = arith.mulf %2, %3 : vector<8x8xf32>
    %5 = vector.broadcast %1 : vector<1x8xf32> to vector<8x8xf32>
    %6 = arith.addf %4, %5 : vector<8x8xf32>
    %c0_4 = arith.constant 0 : index
    %c0_5 = arith.constant 0 : index
    %7 = vector.load %arg3[%c0_4, %c0_5] : memref<208x128xbf16, #tpu.memory_space<vmem>>, vector<8x32xbf16>
    %c192 = arith.constant 192 : index
    %c0_6 = arith.constant 0 : index
    %8 = vector.load %arg3[%c192, %c0_6] : memref<208x128xbf16, #tpu.memory_space<vmem>>, vector<1x32xbf16>
    %9 = arith.extf %8 : vector<1x32xbf16> to vector<1x32xf32>
    %10 = arith.truncf %6 : vector<8x8xf32> to vector<8x8xbf16>
    %cst = arith.constant dense<0.000000e+00> : vector<8x32xf32>
    %11 = tpu.matmul %10, %7, %cst {dimension_numbers = #tpu.dot_dimension_numbers<[1], [0], [0], [1], [0, 0, 1, 1], [], []>} : vector<8x8xbf16>, vector<8x32xbf16>, vector<8x32xf32> -> vector<8x32xf32>
    %12 = vector.broadcast %9 : vector<1x32xf32> to vector<8x32xf32>
    %13 = arith.addf %11, %12 : vector<8x32xf32>
    %14 = math.tanh %13 : vector<8x32xf32>
    %c16 = arith.constant 16 : index
    %c0_7 = arith.constant 0 : index
    %15 = vector.load %arg3[%c16, %c0_7] : memref<208x128xbf16, #tpu.memory_space<vmem>>, vector<32x64xbf16>
    %c193 = arith.constant 193 : index
    %c0_8 = arith.constant 0 : index
    %16 = vector.load %arg3[%c193, %c0_8] : memref<208x128xbf16, #tpu.memory_space<vmem>>, vector<1x64xbf16>
    %17 = arith.extf %16 : vector<1x64xbf16> to vector<1x64xf32>
    %18 = arith.truncf %14 : vector<8x32xf32> to vector<8x32xbf16>
    %cst_9 = arith.constant dense<0.000000e+00> : vector<8x64xf32>
    %19 = tpu.matmul %18, %15, %cst_9 {dimension_numbers = #tpu.dot_dimension_numbers<[1], [0], [0], [1], [0, 0, 1, 1], [], []>} : vector<8x32xbf16>, vector<32x64xbf16>, vector<8x64xf32> -> vector<8x64xf32>
    %20 = vector.broadcast %17 : vector<1x64xf32> to vector<8x64xf32>
    %21 = arith.addf %19, %20 : vector<8x64xf32>
    %22 = math.tanh %21 : vector<8x64xf32>
    %c48 = arith.constant 48 : index
    %c0_10 = arith.constant 0 : index
    %23 = vector.load %arg3[%c48, %c0_10] : memref<208x128xbf16, #tpu.memory_space<vmem>>, vector<64x64xbf16>
    %c194 = arith.constant 194 : index
    %c0_11 = arith.constant 0 : index
    %24 = vector.load %arg3[%c194, %c0_11] : memref<208x128xbf16, #tpu.memory_space<vmem>>, vector<1x64xbf16>
    %25 = arith.extf %24 : vector<1x64xbf16> to vector<1x64xf32>
    %26 = arith.truncf %22 : vector<8x64xf32> to vector<8x64xbf16>
    %cst_12 = arith.constant dense<0.000000e+00> : vector<8x64xf32>
    %27 = tpu.matmul %26, %23, %cst_12 {dimension_numbers = #tpu.dot_dimension_numbers<[1], [0], [0], [1], [0, 0, 1, 1], [], []>} : vector<8x64xbf16>, vector<64x64xbf16>, vector<8x64xf32> -> vector<8x64xf32>
    %28 = vector.broadcast %25 : vector<1x64xf32> to vector<8x64xf32>
    %29 = arith.addf %27, %28 : vector<8x64xf32>
    %30 = math.tanh %29 : vector<8x64xf32>
    %c112 = arith.constant 112 : index
    %c0_13 = arith.constant 0 : index
    %31 = vector.load %arg3[%c112, %c0_13] : memref<208x128xbf16, #tpu.memory_space<vmem>>, vector<64x16xbf16>
    %c195 = arith.constant 195 : index
    %c0_14 = arith.constant 0 : index
    %32 = vector.load %arg3[%c195, %c0_14] : memref<208x128xbf16, #tpu.memory_space<vmem>>, vector<1x16xbf16>
    %33 = arith.extf %32 : vector<1x16xbf16> to vector<1x16xf32>
    %34 = arith.truncf %30 : vector<8x64xf32> to vector<8x64xbf16>
    %cst_15 = arith.constant dense<0.000000e+00> : vector<8x16xf32>
    %35 = tpu.matmul %34, %31, %cst_15 {dimension_numbers = #tpu.dot_dimension_numbers<[1], [0], [0], [1], [0, 0, 1, 1], [], []>} : vector<8x64xbf16>, vector<64x16xbf16>, vector<8x16xf32> -> vector<8x16xf32>
    %36 = vector.broadcast %33 : vector<1x16xf32> to vector<8x16xf32>
    %37 = arith.addf %35, %36 : vector<8x16xf32>
    %cst_16 = arith.constant 0.000000e+00 : f32
    %38 = vector.broadcast %cst_16 : f32 to vector<8x16xf32>
    %39 = arith.maximumf %37, %38 : vector<8x16xf32>
    %c176 = arith.constant 176 : index
    %c0_17 = arith.constant 0 : index
    %40 = vector.load %arg3[%c176, %c0_17] : memref<208x128xbf16, #tpu.memory_space<vmem>>, vector<16x8xbf16>
    %c196 = arith.constant 196 : index
    %c0_18 = arith.constant 0 : index
    %41 = vector.load %arg3[%c196, %c0_18] : memref<208x128xbf16, #tpu.memory_space<vmem>>, vector<1x8xbf16>
    %42 = arith.extf %41 : vector<1x8xbf16> to vector<1x8xf32>
    %43 = arith.truncf %39 : vector<8x16xf32> to vector<8x16xbf16>
    %cst_19 = arith.constant dense<0.000000e+00> : vector<8x8xf32>
    %44 = tpu.matmul %43, %40, %cst_19 {dimension_numbers = #tpu.dot_dimension_numbers<[1], [0], [0], [1], [0, 0, 1, 1], [], []>} : vector<8x16xbf16>, vector<16x8xbf16>, vector<8x8xf32> -> vector<8x8xf32>
    %45 = vector.broadcast %42 : vector<1x8xf32> to vector<8x8xf32>
    %46 = arith.addf %44, %45 : vector<8x8xf32>
    %c0_20 = arith.constant 0 : index
    %c0_21 = arith.constant 0 : index
    %47 = vector.load %arg4[%c0_20, %c0_21] : memref<8x8xf32, #tpu.memory_space<vmem>>, vector<8x8xf32>
    tpu.vector_store %arg4[%c0_20, %c0_21], %46 {strides = array<i32>} : memref<8x8xf32, #tpu.memory_space<vmem>>, vector<8x8xf32>,
    return
  }
  func.func @transform_0(%arg0: i32) -> (i32, i32) {
    %c0_i32 = arith.constant 0 : i32
    %c0_i32_0 = arith.constant 0 : i32
    return %arg0, %c0_i32 : i32, i32
  }
  func.func @transform_1(%arg0: i32) -> (i32, i32) {
    %c0_i32 = arith.constant 0 : i32
    %c0_i32_0 = arith.constant 0 : i32
    %c0_i32_1 = arith.constant 0 : i32
    return %c0_i32, %c0_i32_0 : i32, i32
  }
  func.func @transform_2(%arg0: i32) -> (i32, i32) {
    %c0_i32 = arith.constant 0 : i32
    %c0_i32_0 = arith.constant 0 : i32
    %c0_i32_1 = arith.constant 0 : i32
    return %c0_i32, %c0_i32_0 : i32, i32
  }
  func.func @transform_3(%arg0: i32) -> (i32, i32) {
    %c0_i32 = arith.constant 0 : i32
    %c0_i32_0 = arith.constant 0 : i32
    return %arg0, %c0_i32 : i32, i32
  }
}

</mosaic_0001>

<bundles_post_ra>
// kernel: deep_q_network.1
= control target key start
LH: loop header
LB: loop body
LE: loop exit
PB: predicated region body
PF: predicated region fallthrough
CT: control target
= control target key end

     0   :  { %8 = vsyncpa [#allocation3], 0  ;;  %s803_s12 = smov 0   ;;  %s905_s0 = inlined_call_operand.vmem [shape: f32[16,8], index: 0, kind: input, shape index: {}]   ;;  %s906_s1 = inlined_call_operand.vmem [shape: f32[8,8], index: 1, kind: input, shape index: {}]   ;;  %s907_s2 = inlined_call_operand.hbm [shape: bf16[208,128], index: 2, kind: input, shape index: {}]   ;;  %s908_s3 = inlined_call_operand.vmem [shape: f32[16,8], index: 3, kind: output, shape index: {}]  }
   0x1 LB: > { %s809_s13 = sadd.s32 4294967295, %s776_s12   ;;  %p610_p0 = scmp.ge.s32.totalorder %s776_s12, 1  ;;  %s776_s12 = sphi %s803_s12, %s14_s12  }
   0x2   : > { %p113_p1 = scmp.lt.s32.totalorder %s776_s12, 3  ;;  %s778_s14 = smov [#allocation2]  }
   0x3   : > { %s128_s15 = sshll.u32 %s778_s14, 4  ;;  %p909_p3 = scmp.eq.s32.totalorder %s809_s13, 0  ;;  %s129_s15 = int_to_ptr.vmem [resolvable:$true] %s128_s15 }
   0x4   : > { %p813_p2 = pnand %p610_p0, %p113_p1  ;;  %s738_s20 = scalar_lea.hbm %s907_s2, 1664 }
   0x5   : > { %p739_p6 = scmp.ne.s32.totalorder %s907_s2, %s738_s20  ;;  %p745_p10 = scmp.lt.u32.totalorder %s738_s20, %s907_s2 }
   0x6   : > { %s911_s16 = scalar_select %p813_p2, 1, 0 }
   0x7   : > { %p702_p4 = pneg %p813_p2 }
   0x9   : > { %p822_p5 = pnand %p909_p3, %p702_p4 }
   0xb   : > { %p740_p7 = pneg %p822_p5 }
   0xd   : > { %p741_p8 = pnand %p740_p7, %p739_p6 }
   0xf   : > { %p742_p9 = pneg %p741_p8 }
  0x11   : > { %p747_p11 = pnand %p745_p10, %p742_p9 }
  0x13   : > { %750 = shalt.err (!%p747_p11)
}
  0x14   : > { %s751_s25 = scalar_lea.vmem %s129_s15, 1664  ;;  %p759_p1 = scmp.lt.s32.totalorder %s129_s15, %s129_s15 }
  0x15   : > { %p752_p12 = scmp.ne.s32.totalorder %s129_s15, %s751_s25  ;;  %p760_p4 = scmp.lt.s32.totalorder %s751_s25, %s751_s25 }
  0x17   : > { %p754_p13 = pnand %p752_p12, %p740_p7  ;;  %p761_p3 = por %p760_p4, %p759_p1 }
  0x19   : > { %p755_p0 = pneg %p754_p13 }
  0x1b   : > { %p762_p2 = pnand %p761_p3, %p755_p0 }
  0x1d   : > { %765 = shalt.err (!%p762_p2)
}
  0x1e   : > { %s779_s26 = smov 64   ;;  %s780_s27 = smov 4  }
  0x1f   : > { %705 = dma.hbm_to_vmem [thread:$0]  (!%p822_p5), %s907_s2, 1664, %s129_s15, [#allocation3], %s779_s26, %s779_s26, %s780_s27  }
  0x20   : > { %p913_p6 = scmp.ne.s32.totalorder %s911_s16, 0 }
  0x21   : > { %p914_p8 = scmp.eq.s32.totalorder (!%p913_p6), %s809_s13, 0 }
  0x22   : > { %151 = sbr.rel (%p913_p6) target bundleno = 1168 (0x490), region = 32 }
  0x29   : > { %771 = dma.done.wait (%p914_p8), [#allocation3], 1664   ;;  %p915_p7 = pmov %p914_p8 }
  0x2a   : > { %p173_p2 = scmp.lt.s32.totalorder %s809_s13, 1  ;;  %v781_v0 = vmov 0.0   ;;  %vm782_vm0 = vmmov 0   ;;  %vm207_vm1 = vcmask 1043456   ;;  %v195_v1 = vld [vmem:[#allocation2] sm:$0xf]  ;;  %v199_v11 = vlaneseq }
  0x2b   : > { %773 = vsyncadd (%p915_p7), [#allocation3], 4294965632  ;;  %654 = vmatprep.subr.bf16.mxu0 %v781_v0  ;;  %656 = vmatprep.mubr.msk.bf16.mxu0 %vm782_vm0, %v781_v0  ;;  %v617_v2 = vld [vmem:[%s906_s1] ss:$0 sm:$0xff]  ;;  %vm203_vm2 = vcmask 64512   ;;  %v209_v3 = vsel %vm207_vm1, %v195_v1, 0 }
  0x2c   : > { %s917_s13 = smov (!%p173_p2, %s809_s13), 1  ;;  %660 = vmatprep.subr.bf16.mxu1 %v781_v0  ;;  %664 = vmatprep.mubr.msk.bf16.mxu1 %vm782_vm0, %v781_v0  ;;  %v618_v4 = vld [vmem:[%s906_s1 + $0x1] ss:$0 sm:$0xff]  ;;  %v721_v9 = vld [vmem:[#allocation2 + $0x8] sm:$0xff]   ;;  %v722_v10 = vld [vmem:[#allocation2 + $0x10] sm:$0xff]   ;;  %v876_v12 = vshrl.u32 %v199_v11, 7 }
  0x2d   : > { %s615_s30 = sshll.u32 %s917_s13, 3  ;;  %655 = vmatpush3.bf16.msra.mxu0 %v209_v3  ;;  %661 = vmatpush3.bf16.msra.mxu1 %v721_v9  ;;  %v196_v13 = vld [vmem:[#allocation2 + $0x60] sm:$0x1]  ;;  %vm273_vm3 = vcmask 261120   ;;  %v723_v24 = vld [vmem:[#allocation2 + $0x18] sm:$0xff]   ;;  %v725_v26 = vld [vmem:[#allocation2 + $0x28] sm:$0xff]  }
  0x2e   : > { %s176_s6 = scalar_lea.vmem %s905_s0, %s615_s30  ;;  %668 = vmatprep.subr.bf16.mxu0 %v781_v0  ;;  %662 = vmatprep.subr.bf16.mxu1 %v781_v0  ;;  %v197_v14 = vunpack.c.l.bf16 %v196_v13  ;;  %v201_v15 = vsub.s32 0, %v876_v12  ;;  %v724_v25 = vld [vmem:[#allocation2 + $0x20] sm:$0xff]   ;;  %v726_v27 = vld [vmem:[#allocation2 + $0x30] sm:$0xff]   ;;  %v259_v28 = vsub.s32 1, %v876_v12  ;;  %vm357_vm4 = vcmask 523264   ;;  %v727_v37 = vld [vmem:[#allocation2 + $0x38] sm:$0xff]   ;;  %s180_s15 = scalar_lea.vmem %s908_s3, %s615_s30 }
  0x2f   : > { %v184_v5 = vld [vmem:[%s176_s6] sm:$0xff]  ;;  %v729_v39 = vld [vmem:[#allocation2 + $0x48] sm:$0xff]   ;;  %v730_v40 = vld [vmem:[#allocation2 + $0x50] sm:$0xff]   ;;  %v331_v44 = vsub.s32 2, %v876_v12  ;;  %v413_v53 = vsub.s32 3, %v876_v12  ;;  %vm498_vm5 = vcmask 130048  }
  0x30   : > { %v189_v6 = vmul.f32 %v617_v2, %v184_v5  ;;  %v202_v16 = vrot.slane %v197_v14, %v201_v15  ;;  %v260_v29 = vrot.slane %v197_v14, %v259_v28  ;;  %v728_v38 = vld [vmem:[#allocation2 + $0x40] sm:$0xff]   ;;  %v731_v41 = vld [vmem:[#allocation2 + $0x58] sm:$0xff]  }
  0x31   : > { %663 = vmatpush3.bf16.msra.mxu1 %v722_v10  ;;  %v326_v42 = vld [vmem:[#allocation2 + $0x60] sm:$0x2]  ;;  %v485_v62 = vld [vmem:[#allocation2 + $0x60] sm:$0x4] }
  0x32   : > { %v194_v7 = vadd.f32 %v618_v4, %v189_v6  ;;  %680 = vmatprep.subr.bf16.mxu1 %v781_v0  ;;  %v327_v43 = vunpack.c.l.bf16 %v326_v42  ;;  %v486_v63 = vunpack.c.l.bf16 %v485_v62 }
  0x34   : > { %v198_v8 = vpack.c.bf16 %v194_v7, %v194_v7  ;;  %v332_v45 = vrot.slane %v327_v43, %v331_v44  ;;  %v414_v54 = vrot.slane %v327_v43, %v413_v53 }
  0x36   : > { %657 = vmatmul.mubr.msk.bf16.vlgmr.msra.gmra.mrb[0].mxu0 %vm203_vm2, %v198_v8 }
  0x37   : > { %676 = vmatprep.mubr.msk.bf16.mxu0 %vm782_vm0, %v781_v0  ;;  %669 = vmatpush3.bf16.msra.mxu0 %v723_v24 }
  0x38   : > { %670 = vmatprep.subr.bf16.mxu0 %v781_v0 }
  0x3b   : > { %671 = vmatpush3.bf16.msra.mxu0 %v724_v25 }
  0x3c   : > { %672 = vmatprep.subr.bf16.mxu0 %v781_v0 }
  0x3f   : > { %673 = vmatpush3.bf16.msra.mxu0 %v725_v26 }
  0x40   : > { %674 = vmatprep.subr.bf16.mxu0 %v781_v0 }
  0x43   : > { %675 = vmatpush3.bf16.msra.mxu0 %v726_v27 }
  0x44   : > { %692 = vmatprep.subr.bf16.mxu0 %v781_v0 }
 0x109   : > { %v245_v17 = vpop.f32.mrb[0].mxu0 }
 0x10a   : > { %v246_v18 = vadd.f32 %v245_v17, %v202_v16  ;;  %v658_v19 = vpop.f32.mrb[1].mxu0 }
 0x10b   : > { %v248_v20 = vpop.f32.mrb[2].mxu0 }
 0x10c   : > { %732 = vtanh.f32 %v246_v18  ;;  %v659_v21 = vpop.f32.mrb[3].mxu0 }
 0x116   : > { %v733_v22 = vpop.eup %732 }
 0x117   : > { %v256_v23 = vpack.c.bf16 %v733_v22, %v733_v22 }
 0x119   : > { %665 = vmatmul.mubr.msk.bf16.vlgmr.msra.gmra.mrb[0].mxu1 %vm273_vm3, %v256_v23 }
 0x11a   : > { %688 = vmatprep.mubr.msk.bf16.mxu1 %vm782_vm0, %v781_v0  ;;  %681 = vmatpush3.bf16.msra.mxu1 %v727_v37 }
 0x11b   : > { %682 = vmatprep.subr.bf16.mxu1 %v781_v0 }
 0x11e   : > { %683 = vmatpush3.bf16.msra.mxu1 %v728_v38 }
 0x11f   : > { %684 = vmatprep.subr.bf16.mxu1 %v781_v0 }
 0x122   : > { %685 = vmatpush3.bf16.msra.mxu1 %v729_v39 }
 0x123   : > { %686 = vmatprep.subr.bf16.mxu1 %v781_v0 }
 0x126   : > { %687 = vmatpush3.bf16.msra.mxu1 %v730_v40 }
 0x1ec   : > { %v311_v30 = vpop.f32.mrb[0].mxu1 }
 0x1ed   : > { %v312_v31 = vadd.f32 %v311_v30, %v260_v29  ;;  %v666_v32 = vpop.f32.mrb[1].mxu1 }
 0x1ee   : > { %v314_v33 = vpop.f32.mrb[2].mxu1 }
 0x1ef   : > { %734 = vtanh.f32 %v312_v31  ;;  %v667_v34 = vpop.f32.mrb[3].mxu1 }
 0x1f9   : > { %v735_v35 = vpop.eup %734 }
 0x1fa   : > { %v328_v36 = vpack.c.bf16 %v735_v35, %v735_v35 }
 0x1fc   : > { %677 = vmatmul.mubr.msk.bf16.vlgmr.msra.gmra.mrb[4].mxu0 %vm357_vm4, %v328_v36 }
 0x1fd   : > { %694 = vmatprep.mubr.msk.bf16.mxu0 %vm782_vm0, %v781_v0  ;;  %693 = vmatpush3.bf16.msra.mxu0 %v731_v41  ;;  %v490_v0 = vsub.s32 4, %v876_v12 }
 0x1ff   : > { %v491_v1 = vrot.slane %v486_v63, %v490_v0 }
 0x2cf   : > { %v395_v46 = vpop.f32.mrb[4].mxu0 }
 0x2d0   : > { %v396_v47 = vadd.f32 %v395_v46, %v332_v45  ;;  %v678_v48 = vpop.f32.mrb[5].mxu0 }
 0x2d1   : > { %v398_v49 = vpop.f32.mrb[6].mxu0 }
 0x2d2   : > { %736 = vtanh.f32 %v396_v47  ;;  %v679_v50 = vpop.f32.mrb[7].mxu0 }
 0x2dc   : > { %v737_v51 = vpop.eup %736 }
 0x2dd   : > { %v410_v52 = vpack.c.bf16 %v737_v51, %v737_v51 }
 0x2df   : > { %689 = vmatmul.mubr.msk.bf16.vlgmr.msra.gmra.mrb[4].mxu1 %vm357_vm4, %v410_v52 }
 0x3b2   : > { %v476_v55 = vpop.f32.mrb[4].mxu1 }
 0x3b3   : > { %v477_v56 = vadd.f32 %v476_v55, %v414_v54  ;;  %v690_v57 = vpop.f32.mrb[5].mxu1 }
 0x3b4   : > { %v479_v58 = vpop.f32.mrb[6].mxu1 }
 0x3b5   : > { %v482_v59 = vmax.f32 %v477_v56, 0.0  ;;  %v691_v60 = vpop.f32.mrb[7].mxu1 }
 0x3b7   : > { %v487_v61 = vpack.c.bf16 %v482_v59, %v482_v59 }
 0x3b9   : > { %695 = vmatmul.mubr.msk.bf16.vlgmr.msra.gmra.mrb[8].mxu0 %vm498_vm5, %v487_v61 }
 0x48c   : > { %v536_v2 = vpop.f32.mrb[8].mxu0 }
 0x48d   : > { %v537_v3 = vadd.f32 %v536_v2, %v491_v1  ;;  %v696_v4 = vpop.f32.mrb[9].mxu0 }
 0x48e   : > { %v539_v5 = vpop.f32.mrb[10].mxu0 }
 0x48f   : > { %542 = vst.msk [vmem:[%s180_s15] sm:$0xff] %vm203_vm2, %v537_v3  ;;  %v697_v6 = vpop.f32.mrb[11].mxu0 }
 0x490 PF: > { %s14_s12 = sadd.s32 1, %s776_s12  }
 0x491   : > { %p11_p3 = scmp.ge.s32.totalorder %s14_s12, 4  }
 0x493   :  { %13 = sbr.rel (!%p11_p3) target bundleno = 1 (0x1), region = 67 }
 0x49a   :  { %562 = vsyncpa [#allocation3], 1 }
 0x49b   :  { %564 = vsyncpa [#allocation3 + $0x1], 1 }

</bundles_post_ra>
